<compile_context>
chip_gen: v5e
topology: v5e:2x2
jax: 0.10.0
libtpu: 0.0.40
codegen_flags: <defaults>
</compile_context>

<pallas_src>
import jax
import jax.numpy as jnp
import numpy as np
from jax.experimental import pallas as pl
from jax.experimental.pallas import tpu as pltpu

_TARGET_BLOCK_BYTES = 4 << 20        # ~4 MiB per operand block
_LANE_CANDIDATES = (1024, 512, 256, 128)
_FALLBACK_LANE = 512                 # ragged sizes only


def _h_sigmoid_kernel(x_ref, o_ref):
    # relu6(x + 3) / 6  ==  clamp(x + 3, 0, 6) * (1/6), computed in f32.
    x = x_ref[...].astype(jnp.float32)
    y = jnp.minimum(jnp.maximum(x + 3.0, 0.0), 6.0) * (1.0 / 6.0)
    o_ref[...] = y.astype(o_ref.dtype)


def _sublane_pack(itemsize):
    # rows per sublane group: 8 for 32-bit, 16 for 16-bit, 32 for 8-bit dtypes
    return max(8, 32 // itemsize)


def _choose_row_tile(rows, lane, itemsize):
    pack = _sublane_pack(itemsize)
    target = max(pack,
                 (_TARGET_BLOCK_BYTES // (lane * itemsize)) // pack * pack)
    if rows <= target:
        if rows > 2 * pack:
            # Split into >= 2 grid steps so both v7x TensorCores get work.
            return ((rows + 1) // 2 + pack - 1) // pack * pack
        return rows          # single block equal to the full sublane extent
    return target


def _run_slab(slab):
    rows, lane = slab.shape
    itemsize = jnp.dtype(slab.dtype).itemsize
    row_tile = _choose_row_tile(rows, lane, itemsize)
    grid = (pl.cdiv(rows, row_tile),)

    return pl.pallas_call(
        _h_sigmoid_kernel,
        out_shape=jax.ShapeDtypeStruct((rows, lane), slab.dtype),
        grid_spec=pltpu.PrefetchScalarGridSpec(
            num_scalar_prefetch=0,
            grid=grid,
            in_specs=[pl.BlockSpec((row_tile, lane), lambda i: (i, 0))],
            out_specs=pl.BlockSpec((row_tile, lane), lambda i: (i, 0)),
        ),
        compiler_params=pltpu.CompilerParams(
            dimension_semantics=("parallel",),
            vmem_limit_bytes=32 << 20,
        ),
    )(slab)


def h_sigmoid_pallas(x):
    """Elementwise h_sigmoid on an arbitrarily-shaped array."""
    orig_shape = x.shape
    total = x.size
    dtype = x.dtype

    # Fast path: a lane width (multiple of 128) divides the element count, so
    # packing onto a lane-dense 2-D slab is a copy-free reshape both ways.
    for lane in _LANE_CANDIDATES:
        if total % lane == 0:
            out = _run_slab(x.reshape(total // lane, lane))
            return out.reshape(orig_shape)

    # Ragged fallback: pad only up to the next lane multiple, run, slice back.
    lane = _FALLBACK_LANE
    rows = pl.cdiv(total, lane)
    padded_total = rows * lane
    flat = jnp.concatenate(
        [x.reshape(-1), jnp.zeros((padded_total - total,), dtype)])
    out = _run_slab(flat.reshape(rows, lane))
    return out.reshape(-1)[:total].reshape(orig_shape)


# ------------------------- reference (plain JAX, mirrors PyTorch) ----------
def h_sigmoid_ref(x):
    return jnp.clip(x + 3.0, 0.0, 6.0) / 6.0


if __name__ == "__main__":
    key = jax.random.PRNGKey(0)

    # Small conv-activation-like shape: (N, C, H, W). Size is a multiple of
    # 128, so this exercises the copy-free fast path.
    N, C, H, W = 2, 4, 16, 16
    x = 4.0 * jax.random.normal(key, (N, C, H, W), jnp.float32)
    out = jax.block_until_ready(h_sigmoid_pallas(x))
    ref = jax.block_until_ready(h_sigmoid_ref(x))
    np.testing.assert_allclose(np.asarray(out), np.asarray(ref),
                               rtol=1e-6, atol=1e-6)

    # Ragged size -> padded fallback path.
    xr = 4.0 * jax.random.normal(jax.random.PRNGKey(1), (3, 5, 7), jnp.float32)
    outr = jax.block_until_ready(h_sigmoid_pallas(xr))
    np.testing.assert_allclose(np.asarray(outr), np.asarray(h_sigmoid_ref(xr)),
                               rtol=1e-6, atol=1e-6)

    # bf16 input: kernel computes in f32 and casts on store.
    xb = x.astype(jnp.bfloat16)
    outb = jax.block_until_ready(h_sigmoid_pallas(xb))
    refb = h_sigmoid_ref(x).astype(jnp.bfloat16)
    np.testing.assert_allclose(np.asarray(outb.astype(jnp.float32)),
                               np.asarray(refb.astype(jnp.float32)),
                               rtol=0, atol=1e-2)

    print("KERNEL_OK")
</pallas_src>

<mosaic_0001>
module attributes {stable_mosaic.version = 11 : i64} {
  func.func @_h_sigmoid_kernel(%arg0: i32, %arg1: memref<2x1024xf32, #tpu.memory_space<vmem>>, %arg2: memref<2x1024xf32, #tpu.memory_space<vmem>>) attributes {dimension_semantics = [#tpu.dimension_semantics<parallel>], iteration_bounds = array<i64: 1>, scalar_prefetch = 0 : i64, scratch_operands = 0 : i64, tpu.core_type = #tpu.core_type<tc>, window_params = [{transform_indices = @transform_0, window_bounds = array<i64: 2, 1024>}, {transform_indices = @transform_1, window_bounds = array<i64: 2, 1024>}]} {
    %c0 = arith.constant 0 : index
    %c0_0 = arith.constant 0 : index
    %0 = vector.load %arg1[%c0, %c0_0] : memref<2x1024xf32, #tpu.memory_space<vmem>>, vector<2x1024xf32>
    %cst = arith.constant 3.000000e+00 : f32
    %1 = vector.broadcast %cst : f32 to vector<2x1024xf32>
    %2 = arith.addf %0, %1 : vector<2x1024xf32>
    %cst_1 = arith.constant 0.000000e+00 : f32
    %3 = vector.broadcast %cst_1 : f32 to vector<2x1024xf32>
    %4 = arith.maximumf %2, %3 : vector<2x1024xf32>
    %cst_2 = arith.constant 6.000000e+00 : f32
    %5 = vector.broadcast %cst_2 : f32 to vector<2x1024xf32>
    %6 = arith.minimumf %4, %5 : vector<2x1024xf32>
    %cst_3 = arith.constant 0.166666672 : f32
    %7 = vector.broadcast %cst_3 : f32 to vector<2x1024xf32>
    %8 = arith.mulf %6, %7 : vector<2x1024xf32>
    %c0_4 = arith.constant 0 : index
    %c0_5 = arith.constant 0 : index
    %9 = vector.load %arg2[%c0_4, %c0_5] : memref<2x1024xf32, #tpu.memory_space<vmem>>, vector<2x1024xf32>
    tpu.vector_store %arg2[%c0_4, %c0_5], %8 {strides = array<i32>} : memref<2x1024xf32, #tpu.memory_space<vmem>>, vector<2x1024xf32>,
    return
  }
  func.func @transform_0(%arg0: i32) -> (i32, i32) {
    %c0_i32 = arith.constant 0 : i32
    %c0_i32_0 = arith.constant 0 : i32
    return %arg0, %c0_i32 : i32, i32
  }
  func.func @transform_1(%arg0: i32) -> (i32, i32) {
    %c0_i32 = arith.constant 0 : i32
    %c0_i32_0 = arith.constant 0 : i32
    return %arg0, %c0_i32 : i32, i32
  }
}

</mosaic_0001>

<bundles_post_ra>
// kernel: tpu_custom_call.1
= control target key start
LH: loop header
LB: loop body
LE: loop exit
PB: predicated region body
PF: predicated region fallthrough
CT: control target
= control target key end

     0   :  { %6 = vsyncpa [#allocation3], 0  ;;  %s124_s0 = inlined_call_operand.hbm [shape: f32[2,1024], index: 0, kind: input, shape index: {}]   ;;  %s125_s1 = inlined_call_operand.hbm [shape: f32[2,1024], index: 1, kind: output, shape index: {}]  }
   0x1   :  { %7 = vsyncpa [#allocation4], 0  ;;  %s13_s8 = sshll.u32 %s124_s0, 4  ;;  %s106_s9 = smov [#allocation2]   ;;  %s14_s8 = int_to_ptr.hbm [resolvable:$true] %s13_s8 }
   0x2   :  { %s15_s10 = sshll.u32 %s106_s9, 4  ;;  %s16_s10 = int_to_ptr.vmem [resolvable:$true] %s15_s10 }
   0x3   :  { %18 = dma.hbm_to_vmem [thread:$0]  %s14_s8, 256, %s16_s10, [#allocation3]  }
   0x4   :  { %102 = dma.done.wait [#allocation3], 256  }
   0x5   :  { %103 = vsyncadd [#allocation3], 4294967040  ;;  %v23_v0 = vld [vmem:[#allocation2] sm:$0xff]  ;;  %v24_v1 = vld [vmem:[#allocation2 + $0x8] sm:$0xff]  ;;  %s107_s11 = smov [#allocation5]   ;;  %s42_s0 = sshll.u32 %s125_s1, 4  ;;  %s43_s0 = int_to_ptr.hbm [resolvable:$true] %s42_s0 }
   0x6   :  { %v25_v2 = vadd.f32 3.0, %v23_v0  ;;  %v26_v3 = vadd.f32 3.0, %v24_v1  ;;  %s40_s12 = sshll.u32 %s107_s11, 4  ;;  %s41_s12 = int_to_ptr.vmem [resolvable:$true] %s40_s12 }
   0x8   :  { %v27_v4 = vmax.f32 %v25_v2, 0.0  ;;  %v28_v5 = vmax.f32 %v26_v3, 0.0 }
   0xa   :  { %v29_v6 = vmin.f32 %v27_v4, 6.0  ;;  %v30_v7 = vmin.f32 %v28_v5, 6.0 }
   0xc   :  { %v31_v8 = vmul.f32 0.16666667, %v29_v6  ;;  %v32_v9 = vmul.f32 0.16666667, %v30_v7 }
   0xe   :  { %33 = vst [vmem:[#allocation5] sm:$0xff] %v31_v8 }
   0xf   :  { %34 = vst [vmem:[#allocation5 + $0x8] sm:$0xff] %v32_v9 }
  0x10   :  { %45 = dma.vmem_to_hbm [thread:$0]  %s41_s12, 256, %s43_s0, [#allocation4]  }
  0x11   :  { %104 = dma.done.wait [#allocation4], 256  }
  0x12   :  { %105 = vsyncadd [#allocation4], 4294967040 }
  0x13   :  { %50 = vsyncpa [#allocation3], 1 }
  0x14   :  { %51 = vsyncpa [#allocation4], 1 }

</bundles_post_ra>
